<compile_context>
chip_gen: v7x
topology: tpu7x:2x2x1
jax: 0.10.0
libtpu: 0.0.40
codegen_flags: <defaults>
</compile_context>

<pallas_src>
import math

import jax
import jax.numpy as jnp
from jax.experimental import pallas as pl
from jax.experimental.pallas import tpu as pltpu


def _round_up(a, b):
    return -(-a // b) * b


def _padded_tile_bytes(rows, cols, dtype):
    """VMEM bytes of a (rows, cols) tile after sublane/lane padding."""
    it = jnp.dtype(dtype).itemsize
    sub = 8 * max(1, 4 // it)  # f32 -> 8, bf16 -> 16, int8 -> 32 sublanes
    return _round_up(max(rows, 1), sub) * _round_up(max(cols, 1), 128) * it


def _avgpool3d_kernel(ph2_ref, pw_ref, x_ref, o_ref, t_ref):
    # ph2_ref: (Ho, 2*H)   depth-pair + H pooling matrix (input dtype, 0/1)
    # pw_ref : (W, Wo)     W pooling matrix, f32, pre-scaled by 1/8
    # x_ref  : (BT, 2*H, W) BT depth-pair slabs (two consecutive D slices each)
    # o_ref  : (BT*Ho, Wo) pooled output rows
    # t_ref  : (BT*Ho, W)  f32 scratch holding the H-pooled slabs
    bt = x_ref.shape[0]
    ho = ph2_ref.shape[0]

    def body(d, carry):
        start = d * ho
        if ho % 8 == 0:  # static (Python) condition; alignment hint only
            start = pl.multiple_of(start, 8)
        # Depth-pair sum + H-pool in one MXU matmul on the native input dtype.
        t_ref[pl.ds(start, ho), :] = jnp.dot(
            ph2_ref[...], x_ref[d], preferred_element_type=jnp.float32
        )
        return carry

    jax.lax.fori_loop(0, bt, body, 0)

    # One batched W-pool matmul over the whole block + one bulk store.
    o = jnp.dot(t_ref[...], pw_ref[...], preferred_element_type=jnp.float32)
    o_ref[...] = o.astype(o_ref.dtype)


def unet_block_down(x, *, vmem_budget_bytes=16 * 1024 * 1024, max_bt=512):
    """AvgPool3d(kernel_size=2, stride=2) on an NCDHW tensor via Pallas."""
    if not jnp.issubdtype(x.dtype, jnp.floating):
        x = x.astype(jnp.float32)

    N, C, D, H, W = x.shape
    Do, Ho, Wo = D // 2, H // 2, W // 2
    if Do == 0 or Ho == 0 or Wo == 0:
        raise ValueError("AvgPool3d(kernel_size=2) needs every spatial dim >= 2")

    # Only an odd depth needs cropping (copy only in that rare case); odd H/W
    # rows/cols simply get zero weight in the pooling matrices, so for even D
    # the reshape below is a free, contiguous view of x.
    if D != 2 * Do:
        x = x[:, :, : 2 * Do]
    ncdo = N * C * Do
    xr = x.reshape(ncdo, 2 * H, W)  # depth-pair slabs, row-major order unchanged

    dtype = x.dtype
    itemsize = jnp.dtype(dtype).itemsize

    # Pooling matrices, built once, resident in VMEM via constant index_map.
    # ph2 = [ph | ph]: slab rows [0, H) are depth slice 2d, rows [H, 2H) are
    # slice 2d+1, so one matmul does the depth-pair sum and the H pool.
    ph = (jnp.arange(H)[None, :] // 2 == jnp.arange(Ho)[:, None])
    ph2 = jnp.concatenate([ph, ph], axis=1).astype(dtype)            # (Ho, 2H)
    pw = (jnp.arange(W)[:, None] // 2 == jnp.arange(Wo)[None, :]).astype(
        jnp.float32
    ) * 0.125                                                         # (W, Wo)

    # ---- Block-size selection from padded VMEM footprints -------------------
    pool_bytes = (_padded_tile_bytes(Ho, 2 * H, dtype)
                  + _padded_tile_bytes(W, Wo, jnp.float32))

    def vmem_total(bt):
        in_blk = bt * _padded_tile_bytes(2 * H, W, dtype)
        out_blk = _padded_tile_bytes(bt * Ho, Wo, dtype)
        t_blk = _padded_tile_bytes(bt * Ho, W, jnp.float32)
        return 2 * in_blk + 2 * out_blk + t_blk + 2 * pool_bytes

    per_bt = (2 * _padded_tile_bytes(2 * H, W, dtype)
              + 2 * Ho * _round_up(Wo, 128) * itemsize
              + Ho * _round_up(W, 128) * 4)
    bt = max(1, (vmem_budget_bytes - 2 * pool_bytes) // per_bt)
    bt = int(min(bt, ncdo, max_bt))
    if bt < ncdo:
        # Output block sublane dim (bt*Ho) must be a multiple of 8 unless the
        # block covers the full axis.
        step = 8 // math.gcd(Ho, 8)
        bt_r = (bt // step) * step
        bt = bt_r if bt_r >= step else min(ncdo, step)
    bt = min(bt, ncdo)

    grid = (pl.cdiv(ncdo, bt),)
    vmem_limit = int(min(vmem_total(bt) + 4 * 1024 * 1024, 64 * 1024 * 1024))

    flops = int(ncdo * (2 * Ho * (2 * H) * W + 2 * Ho * W * Wo))
    bytes_accessed = int(ncdo * 2 * H * W * itemsize + ncdo * Ho * Wo * itemsize)

    out = pl.pallas_call(
        _avgpool3d_kernel,
        out_shape=jax.ShapeDtypeStruct((ncdo * Ho, Wo), dtype),
        grid_spec=pltpu.PrefetchScalarGridSpec(
            num_scalar_prefetch=0,
            grid=grid,
            in_specs=[
                # Resident pooling matrices (constant index_map -> fetched once).
                pl.BlockSpec((Ho, 2 * H), lambda j: (0, 0)),
                pl.BlockSpec((W, Wo), lambda j: (0, 0)),
                # BT depth-pair slabs per step.
                pl.BlockSpec((bt, 2 * H, W), lambda j: (j, 0, 0)),
            ],
            out_specs=pl.BlockSpec((bt * Ho, Wo), lambda j: (j, 0)),
            scratch_shapes=[pltpu.VMEM((bt * Ho, W), jnp.float32)],
        ),
        compiler_params=pltpu.CompilerParams(
            dimension_semantics=("parallel",),
            vmem_limit_bytes=vmem_limit,
        ),
        cost_estimate=pl.CostEstimate(
            flops=flops, transcendentals=0, bytes_accessed=bytes_accessed
        ),
    )(ph2, pw, xr)

    return out.reshape(N, C, Do, Ho, Wo)


def _reference(x):
    N, C, D, H, W = x.shape
    Do, Ho, Wo = D // 2, H // 2, W // 2
    xc = x[:, :, : 2 * Do, : 2 * Ho, : 2 * Wo]
    return xc.reshape(N, C, Do, 2, Ho, 2, Wo, 2).mean(axis=(3, 5, 7))


if __name__ == "__main__":
    # UnetBlock_Down has no learned parameters; the forward is purely the
    # 2x2x2 average pool.
    key = jax.random.PRNGKey(0)

    # Even-dimension case (canonical AvgPool3d use).
    N, C, D, H, W = 2, 4, 8, 16, 16
    x = jax.random.normal(key, (N, C, D, H, W), dtype=jnp.float32)
    y = jax.block_until_ready(unet_block_down(x))
    ref = _reference(x)
    assert y.shape == (N, C, D // 2, H // 2, W // 2), y.shape
    assert jnp.allclose(y, ref, atol=1e-5, rtol=1e-5), float(jnp.max(jnp.abs(y - ref)))

    # Odd-dimension case (exercises AvgPool3d floor/crop behavior).
    x2 = jax.random.normal(jax.random.PRNGKey(1), (1, 2, 5, 9, 11), dtype=jnp.float32)
    y2 = jax.block_until_ready(unet_block_down(x2))
    ref2 = _reference(x2)
    assert y2.shape == (1, 2, 2, 4, 5), y2.shape
    assert jnp.allclose(y2, ref2, atol=1e-5, rtol=1e-5), float(
        jnp.max(jnp.abs(y2 - ref2))
    )

    print("KERNEL_OK")
</pallas_src>

<mosaic_0001>
module attributes {stable_mosaic.version = 11 : i64} {
  func.func @_avgpool3d_kernel(%arg0: i32, %arg1: memref<8x32xf32, #tpu.memory_space<vmem>>, %arg2: memref<16x8xf32, #tpu.memory_space<vmem>>, %arg3: memref<32x32x16xf32, #tpu.memory_space<vmem>>, %arg4: memref<256x8xf32, #tpu.memory_space<vmem>>, %arg5: memref<256x16xf32, #tpu.memory_space<vmem>>) attributes {dimension_semantics = [#tpu.dimension_semantics<parallel>], iteration_bounds = array<i64: 1>, scalar_prefetch = 0 : i64, scratch_operands = 1 : i64, tpu.core_type = #tpu.core_type<tc>, window_params = [{pipeline_mode = #tpu.pipeline_mode<synchronous>, transform_indices = @transform_0, window_bounds = array<i64: 8, 32>}, {pipeline_mode = #tpu.pipeline_mode<synchronous>, transform_indices = @transform_1, window_bounds = array<i64: 16, 8>}, {transform_indices = @transform_2, window_bounds = array<i64: 32, 32, 16>}, {transform_indices = @transform_3, window_bounds = array<i64: 256, 8>}]} {
    %c0_i32 = arith.constant 0 : i32
    %c32_i32 = arith.constant 32 : i32
    %0 = arith.addi %c0_i32, %c32_i32 : i32
    %c1_i32 = arith.constant 1 : i32
    scf.for %arg6 = %c0_i32 to %0 step %c1_i32  : i32 {
      %c8_i32 = arith.constant 8 : i32
      %5 = arith.muli %arg6, %c8_i32 : i32
      %6 = tpu.assume_multiple %5, 8 : i32
      %c0_6 = arith.constant 0 : index
      %c0_7 = arith.constant 0 : index
      %7 = vector.load %arg1[%c0_6, %c0_7] : memref<8x32xf32, #tpu.memory_space<vmem>>, vector<8x32xf32>
      %8 = arith.index_cast %arg6 : i32 to index
      %c0_8 = arith.constant 0 : index
      %c0_9 = arith.constant 0 : index
      %9 = vector.load %arg3[%8, %c0_8, %c0_9] : memref<32x32x16xf32, #tpu.memory_space<vmem>>, vector<1x32x16xf32>
      %10 = vector.shape_cast %9 : vector<1x32x16xf32> to vector<32x16xf32>
      %cst_10 = arith.constant dense<0.000000e+00> : vector<8x16xf32>
      %11 = tpu.matmul %7, %10, %cst_10 {dimension_numbers = #tpu.dot_dimension_numbers<[1], [0], [0], [1], [0, 0, 1, 1], [], []>} : vector<8x32xf32>, vector<32x16xf32>, vector<8x16xf32> -> vector<8x16xf32>
      %12 = arith.index_cast %6 : i32 to index
      %c0_11 = arith.constant 0 : index
      %13 = vector.load %arg5[%12, %c0_11] : memref<256x16xf32, #tpu.memory_space<vmem>>, vector<8x16xf32>
      tpu.vector_store %arg5[%12, %c0_11], %11 {strides = array<i32>} : memref<256x16xf32, #tpu.memory_space<vmem>>, vector<8x16xf32>,
    }
    %c32_i32_0 = arith.constant 32 : i32
    %c0 = arith.constant 0 : index
    %c0_1 = arith.constant 0 : index
    %1 = vector.load %arg5[%c0, %c0_1] : memref<256x16xf32, #tpu.memory_space<vmem>>, vector<256x16xf32>
    %c0_2 = arith.constant 0 : index
    %c0_3 = arith.constant 0 : index
    %2 = vector.load %arg2[%c0_2, %c0_3] : memref<16x8xf32, #tpu.memory_space<vmem>>, vector<16x8xf32>
    %cst = arith.constant dense<0.000000e+00> : vector<256x8xf32>
    %3 = tpu.matmul %1, %2, %cst {dimension_numbers = #tpu.dot_dimension_numbers<[1], [0], [0], [1], [0, 0, 1, 1], [], []>} : vector<256x16xf32>, vector<16x8xf32>, vector<256x8xf32> -> vector<256x8xf32>
    %c0_4 = arith.constant 0 : index
    %c0_5 = arith.constant 0 : index
    %4 = vector.load %arg4[%c0_4, %c0_5] : memref<256x8xf32, #tpu.memory_space<vmem>>, vector<256x8xf32>
    tpu.vector_store %arg4[%c0_4, %c0_5], %3 {strides = array<i32>} : memref<256x8xf32, #tpu.memory_space<vmem>>, vector<256x8xf32>,
    return
  }
  func.func @transform_0(%arg0: i32) -> (i32, i32) {
    %c0_i32 = arith.constant 0 : i32
    %c0_i32_0 = arith.constant 0 : i32
    %c0_i32_1 = arith.constant 0 : i32
    return %c0_i32, %c0_i32_0 : i32, i32
  }
  func.func @transform_1(%arg0: i32) -> (i32, i32) {
    %c0_i32 = arith.constant 0 : i32
    %c0_i32_0 = arith.constant 0 : i32
    %c0_i32_1 = arith.constant 0 : i32
    return %c0_i32, %c0_i32_0 : i32, i32
  }
  func.func @transform_2(%arg0: i32) -> (i32, i32, i32) {
    %c0_i32 = arith.constant 0 : i32
    %c0_i32_0 = arith.constant 0 : i32
    %c0_i32_1 = arith.constant 0 : i32
    return %arg0, %c0_i32, %c0_i32_0 : i32, i32, i32
  }
  func.func @transform_3(%arg0: i32) -> (i32, i32) {
    %c0_i32 = arith.constant 0 : i32
    %c0_i32_0 = arith.constant 0 : i32
    return %arg0, %c0_i32 : i32, i32
  }
}

</mosaic_0001>

<bundles_post_ra>
// kernel: tpu_custom_call.1
= control target key start
LH: loop header
LB: loop body
LE: loop exit
PB: predicated region body
PF: predicated region fallthrough
CT: control target
= control target key end

     0   :  { %s698_s12 = smov 0   ;;  %s876_s0 = inlined_call_operand.vmem [shape: f32[8,32], index: 0, kind: input, shape index: {}]   ;;  %s877_s1 = inlined_call_operand.vmem [shape: f32[16,8], index: 1, kind: input, shape index: {}]   ;;  %s878_s2 = inlined_call_operand.vmem [shape: f32[32,32,16], index: 2, kind: input, shape index: {}]   ;;  %s879_s3 = inlined_call_operand.vmem [shape: f32[256,8], index: 3, kind: output, shape index: {}]  }
   0x1 LB: > { %v675_v0 = vmov 0.0|0.0   ;;  %vm676_vm0 = vmmov 0   ;;  %v677_v1 = vmov 0.0   ;;  %s508_s13 = sshll.u32 %s673_s12, 5  ;;  %v21_v8 = vld [vmem:[%s876_s0] sm:$0xff]  ;;  %vm28_vm1 = vcmask 261120   ;;  %s673_s12 = sphi %s698_s12, %s19_s12  }
   0x2   : > { %644 = vmatprep.subr.bf16.mxu0 %v675_v0  ;;  %589 = vmatprep.mubr.msk.f32.mxu0 %vm676_vm0, %v677_v1  ;;  %s23_s16 = scalar_lea.vmem %s878_s2, %s508_s13  ;;  %s507_s19 = sshll.u32 %s673_s12, 3  ;;  %vm103_vm2 = vcmask 130048  }
   0x3   : > { %v24_v2 = vld [vmem:[%s23_s16] sm:$0xff]  ;;  %v25_v3 = vld [vmem:[%s23_s16 + $0x8] sm:$0xff]  ;;  %v26_v4 = vld [vmem:[%s23_s16 + $0x10] sm:$0xff]  ;;  %s102_s20 = scalar_lea.vmem [#allocation2], %s507_s19  ;;  %s19_s12 = sadd.s32 1, %s673_s12  }
   0x4   : > { %v645_v5 = vpack.c.bf16 %v25_v3, %v24_v2  ;;  %v27_v6 = vld [vmem:[%s23_s16 + $0x18] sm:$0xff]  ;;  %p16_p0 = scmp.ge.s32.totalorder %s19_s12, 32  }
   0x5   : > { %v648_v7 = vpack.c.bf16 %v27_v6, %v26_v4  ;;  %v137_v11 = vld [vmem:[%s877_s1] sm:$0xff] (%p16_p0)  ;;  %v138_v12 = vld [vmem:[%s877_s1 + $0x8] sm:$0xff] (%p16_p0)  ;;  %vm461_vm3 = vcmask (%p16_p0), 64512  }
   0x6   : > { %646 = vmatpush3.bf16.msra.mxu0 %v645_v5  ;;  %v650_v14 = vpack.c.bf16 (%p16_p0), %v138_v12, %v137_v11 }
   0x7   : > { %647 = vmatprep.subr.bf16.mxu0 %v675_v0 }
   0x8   :  { %654 = vmatprep.subr.bf16.mxu1 (%p16_p0), %v650_v14 }
   0x9   :  { %655 = vmatpush3.bf16.msra.mxu1 (%p16_p0), %v650_v14 }
   0xa   : > { %649 = vmatpush3.bf16.msra.mxu0 %v648_v7 }
   0xb   :  { %651 = vmatprep.subr.bf16.mxu0 (%p16_p0), %v650_v14 }
   0xd   : > { %590 = vmatmul.mubr.msk.f32.vlgmr.msra.gmra.mrb[0].mxu0 %vm28_vm1, %v21_v8 }
   0xe   :  { %653 = vmatpush3.bf16.msra.mxu0 (%p16_p0), %v650_v14 }
  0xdb   :  { %18 = sbr.rel (!%p16_p0) target bundleno = 1 (0x1), region = 41 }
  0xe0   : > { %v98_v9 = vpop.f32.mrb[0].mxu0 }
  0xe1   : > { %104 = vst.msk [vmem:[%s102_s20] sm:$0xff] %vm103_vm2, %v98_v9  ;;  %v591_v10 = vpop.f32.mrb[1].mxu0 }
  0xe8   :  { %v105_v13 = vld [vmem:[#allocation2] sm:$0xff]  ;;  %v106_v16 = vld [vmem:[#allocation2 + $0x8] sm:$0xff]  ;;  %v107_v18 = vld [vmem:[#allocation2 + $0x10] sm:$0xff] }
  0xe9   :  { %596 = vmatprep.mubr.msk.f32.mxu0 %vm103_vm2, %v105_v13  ;;  %v121_v15 = vld [vmem:[#allocation2 + $0x80] sm:$0xff]  ;;  %v122_v17 = vld [vmem:[#allocation2 + $0x88] sm:$0xff]  ;;  %v123_v19 = vld [vmem:[#allocation2 + $0x90] sm:$0xff] }
  0xea   :  { %620 = vmatprep.mubr.msk.f32.mxu1 %vm103_vm2, %v121_v15  ;;  %597 = vmatmul.mubr.msk.f32.vlgmr.msra.gmra.mrb[0].mxu0 %vm103_vm2, %v106_v16  ;;  %v108_v20 = vld [vmem:[#allocation2 + $0x18] sm:$0xff]  ;;  %v109_v22 = vld [vmem:[#allocation2 + $0x20] sm:$0xff]  ;;  %v110_v24 = vld [vmem:[#allocation2 + $0x28] sm:$0xff] }
  0xeb   :  { %621 = vmatmul.mubr.msk.f32.vlgmr.msra.gmra.mrb[0].mxu1 %vm103_vm2, %v122_v17  ;;  %599 = vmatprep.mubr.msk.f32.mxu0 %vm103_vm2, %v107_v18  ;;  %v124_v21 = vld [vmem:[#allocation2 + $0x98] sm:$0xff]  ;;  %v125_v23 = vld [vmem:[#allocation2 + $0xa0] sm:$0xff]  ;;  %v126_v25 = vld [vmem:[#allocation2 + $0xa8] sm:$0xff] }
  0xec   :  { %623 = vmatprep.mubr.msk.f32.mxu1 %vm103_vm2, %v123_v19  ;;  %v111_v26 = vld [vmem:[#allocation2 + $0x30] sm:$0xff]  ;;  %v112_v28 = vld [vmem:[#allocation2 + $0x38] sm:$0xff]  ;;  %v113_v30 = vld [vmem:[#allocation2 + $0x40] sm:$0xff] }
  0xed   :  { %v127_v27 = vld [vmem:[#allocation2 + $0xb0] sm:$0xff]  ;;  %v128_v29 = vld [vmem:[#allocation2 + $0xb8] sm:$0xff]  ;;  %v129_v31 = vld [vmem:[#allocation2 + $0xc0] sm:$0xff] }
  0xee   :  { %600 = vmatmul.mubr.msk.f32.gmra.mrb[2].mxu0 %vm103_vm2, %v108_v20  ;;  %v114_v32 = vld [vmem:[#allocation2 + $0x48] sm:$0xff]  ;;  %v115_v34 = vld [vmem:[#allocation2 + $0x50] sm:$0xff]  ;;  %v116_v36 = vld [vmem:[#allocation2 + $0x58] sm:$0xff] }
  0xef   :  { %624 = vmatmul.mubr.msk.f32.gmra.mrb[2].mxu1 %vm103_vm2, %v124_v21  ;;  %602 = vmatprep.mubr.msk.f32.mxu0 %vm103_vm2, %v109_v22  ;;  %v130_v33 = vld [vmem:[#allocation2 + $0xc8] sm:$0xff]  ;;  %v131_v35 = vld [vmem:[#allocation2 + $0xd0] sm:$0xff]  ;;  %v132_v37 = vld [vmem:[#allocation2 + $0xd8] sm:$0xff] }
  0xf0   :  { %626 = vmatprep.mubr.msk.f32.mxu1 %vm103_vm2, %v125_v23  ;;  %v117_v38 = vld [vmem:[#allocation2 + $0x60] sm:$0xff]  ;;  %v118_v40 = vld [vmem:[#allocation2 + $0x68] sm:$0xff]  ;;  %v119_v42 = vld [vmem:[#allocation2 + $0x70] sm:$0xff] }
  0xf1   :  { %v133_v39 = vld [vmem:[#allocation2 + $0xe0] sm:$0xff]  ;;  %v134_v41 = vld [vmem:[#allocation2 + $0xe8] sm:$0xff]  ;;  %v135_v43 = vld [vmem:[#allocation2 + $0xf0] sm:$0xff] }
  0xf2   :  { %603 = vmatmul.mubr.msk.f32.gmra.mrb[4].mxu0 %vm103_vm2, %v110_v24  ;;  %v120_v44 = vld [vmem:[#allocation2 + $0x78] sm:$0xff] }
  0xf3   :  { %627 = vmatmul.mubr.msk.f32.gmra.mrb[4].mxu1 %vm103_vm2, %v126_v25  ;;  %605 = vmatprep.mubr.msk.f32.mxu0 %vm103_vm2, %v111_v26  ;;  %v136_v45 = vld [vmem:[#allocation2 + $0xf8] sm:$0xff] }
  0xf4   :  { %629 = vmatprep.mubr.msk.f32.mxu1 %vm103_vm2, %v127_v27 }
  0xf6   :  { %606 = vmatmul.mubr.msk.f32.gmra.mrb[6].mxu0 %vm103_vm2, %v112_v28 }
  0xf7   :  { %630 = vmatmul.mubr.msk.f32.gmra.mrb[6].mxu1 %vm103_vm2, %v128_v29  ;;  %608 = vmatprep.mubr.msk.f32.mxu0 %vm103_vm2, %v113_v30 }
  0xf8   :  { %632 = vmatprep.mubr.msk.f32.mxu1 %vm103_vm2, %v129_v31 }
  0xfa   :  { %609 = vmatmul.mubr.msk.f32.gmra.mrb[8].mxu0 %vm103_vm2, %v114_v32 }
  0xfb   :  { %633 = vmatmul.mubr.msk.f32.gmra.mrb[8].mxu1 %vm103_vm2, %v130_v33  ;;  %611 = vmatprep.mubr.msk.f32.mxu0 %vm103_vm2, %v115_v34 }
  0xfc   :  { %635 = vmatprep.mubr.msk.f32.mxu1 %vm103_vm2, %v131_v35 }
  0xfe   :  { %612 = vmatmul.mubr.msk.f32.gmra.mrb[10].mxu0 %vm103_vm2, %v116_v36 }
  0xff   :  { %636 = vmatmul.mubr.msk.f32.gmra.mrb[10].mxu1 %vm103_vm2, %v132_v37  ;;  %614 = vmatprep.mubr.msk.f32.mxu0 %vm103_vm2, %v117_v38 }
 0x100   :  { %638 = vmatprep.mubr.msk.f32.mxu1 %vm103_vm2, %v133_v39 }
 0x102   :  { %615 = vmatmul.mubr.msk.f32.gmra.mrb[12].mxu0 %vm103_vm2, %v118_v40 }
 0x103   :  { %639 = vmatmul.mubr.msk.f32.gmra.mrb[12].mxu1 %vm103_vm2, %v134_v41  ;;  %617 = vmatprep.mubr.msk.f32.mxu0 %vm103_vm2, %v119_v42 }
 0x104   :  { %641 = vmatprep.mubr.msk.f32.mxu1 %vm103_vm2, %v135_v43 }
 0x106   :  { %618 = vmatmul.mubr.msk.f32.gmra.mrb[14].mxu0 %vm103_vm2, %v120_v44 }
 0x107   :  { %642 = vmatmul.mubr.msk.f32.gmra.mrb[14].mxu1 %vm103_vm2, %v136_v45 }
 0x1bd   :  { %v598_v46 = vpop.f32.mrb[0].mxu0 }
 0x1be   :  { %v622_v47 = vpop.f32.mrb[0].mxu1  ;;  %463 = vst.msk [vmem:[%s879_s3 + $0x8] sm:$0xff] %vm461_vm3, %v598_v46  ;;  %v302_v48 = vpop.f32.mrb[1].mxu0 }
 0x1bf   :  { %479 = vst.msk [vmem:[%s879_s3 + $0x88] sm:$0xff] %vm461_vm3, %v622_v47  ;;  %v382_v49 = vpop.f32.mrb[1].mxu1  ;;  %462 = vst.msk [vmem:[%s879_s3] sm:$0xff] %vm461_vm3, %v302_v48 }
 0x1c0   :  { %478 = vst.msk [vmem:[%s879_s3 + $0x80] sm:$0xff] %vm461_vm3, %v382_v49 }
 0x1c1   :  { %v601_v50 = vpop.f32.mrb[2].mxu0 }
 0x1c2   :  { %v625_v51 = vpop.f32.mrb[2].mxu1  ;;  %465 = vst.msk [vmem:[%s879_s3 + $0x18] sm:$0xff] %vm461_vm3, %v601_v50  ;;  %v312_v52 = vpop.f32.mrb[3].mxu0 }
 0x1c3   :  { %481 = vst.msk [vmem:[%s879_s3 + $0x98] sm:$0xff] %vm461_vm3, %v625_v51  ;;  %v392_v53 = vpop.f32.mrb[3].mxu1  ;;  %464 = vst.msk [vmem:[%s879_s3 + $0x10] sm:$0xff] %vm461_vm3, %v312_v52 }
 0x1c4   :  { %480 = vst.msk [vmem:[%s879_s3 + $0x90] sm:$0xff] %vm461_vm3, %v392_v53 }
 0x1c5   :  { %v604_v54 = vpop.f32.mrb[4].mxu0 }
 0x1c6   :  { %v628_v55 = vpop.f32.mrb[4].mxu1  ;;  %467 = vst.msk [vmem:[%s879_s3 + $0x28] sm:$0xff] %vm461_vm3, %v604_v54  ;;  %v322_v56 = vpop.f32.mrb[5].mxu0 }
 0x1c7   :  { %483 = vst.msk [vmem:[%s879_s3 + $0xa8] sm:$0xff] %vm461_vm3, %v628_v55  ;;  %v402_v57 = vpop.f32.mrb[5].mxu1  ;;  %466 = vst.msk [vmem:[%s879_s3 + $0x20] sm:$0xff] %vm461_vm3, %v322_v56 }
 0x1c8   :  { %482 = vst.msk [vmem:[%s879_s3 + $0xa0] sm:$0xff] %vm461_vm3, %v402_v57 }
 0x1c9   :  { %v607_v58 = vpop.f32.mrb[6].mxu0 }
 0x1ca   :  { %v631_v59 = vpop.f32.mrb[6].mxu1  ;;  %469 = vst.msk [vmem:[%s879_s3 + $0x38] sm:$0xff] %vm461_vm3, %v607_v58  ;;  %v332_v60 = vpop.f32.mrb[7].mxu0 }
 0x1cb   :  { %485 = vst.msk [vmem:[%s879_s3 + $0xb8] sm:$0xff] %vm461_vm3, %v631_v59  ;;  %v412_v61 = vpop.f32.mrb[7].mxu1  ;;  %468 = vst.msk [vmem:[%s879_s3 + $0x30] sm:$0xff] %vm461_vm3, %v332_v60 }
 0x1cc   :  { %484 = vst.msk [vmem:[%s879_s3 + $0xb0] sm:$0xff] %vm461_vm3, %v412_v61 }
 0x1cd   :  { %v610_v62 = vpop.f32.mrb[8].mxu0 }
 0x1ce   :  { %v634_v63 = vpop.f32.mrb[8].mxu1  ;;  %471 = vst.msk [vmem:[%s879_s3 + $0x48] sm:$0xff] %vm461_vm3, %v610_v62  ;;  %v342_v0 = vpop.f32.mrb[9].mxu0 }
 0x1cf   :  { %487 = vst.msk [vmem:[%s879_s3 + $0xc8] sm:$0xff] %vm461_vm3, %v634_v63  ;;  %v422_v1 = vpop.f32.mrb[9].mxu1  ;;  %470 = vst.msk [vmem:[%s879_s3 + $0x40] sm:$0xff] %vm461_vm3, %v342_v0 }
 0x1d0   :  { %486 = vst.msk [vmem:[%s879_s3 + $0xc0] sm:$0xff] %vm461_vm3, %v422_v1 }
 0x1d1   :  { %v613_v2 = vpop.f32.mrb[10].mxu0 }
 0x1d2   :  { %v637_v3 = vpop.f32.mrb[10].mxu1  ;;  %473 = vst.msk [vmem:[%s879_s3 + $0x58] sm:$0xff] %vm461_vm3, %v613_v2  ;;  %v352_v4 = vpop.f32.mrb[11].mxu0 }
 0x1d3   :  { %489 = vst.msk [vmem:[%s879_s3 + $0xd8] sm:$0xff] %vm461_vm3, %v637_v3  ;;  %v432_v5 = vpop.f32.mrb[11].mxu1  ;;  %472 = vst.msk [vmem:[%s879_s3 + $0x50] sm:$0xff] %vm461_vm3, %v352_v4 }
 0x1d4   :  { %488 = vst.msk [vmem:[%s879_s3 + $0xd0] sm:$0xff] %vm461_vm3, %v432_v5 }
 0x1d5   :  { %v616_v6 = vpop.f32.mrb[12].mxu0 }
 0x1d6   :  { %v640_v7 = vpop.f32.mrb[12].mxu1  ;;  %475 = vst.msk [vmem:[%s879_s3 + $0x68] sm:$0xff] %vm461_vm3, %v616_v6  ;;  %v362_v8 = vpop.f32.mrb[13].mxu0 }
 0x1d7   :  { %491 = vst.msk [vmem:[%s879_s3 + $0xe8] sm:$0xff] %vm461_vm3, %v640_v7  ;;  %v442_v9 = vpop.f32.mrb[13].mxu1  ;;  %474 = vst.msk [vmem:[%s879_s3 + $0x60] sm:$0xff] %vm461_vm3, %v362_v8 }
 0x1d8   :  { %490 = vst.msk [vmem:[%s879_s3 + $0xe0] sm:$0xff] %vm461_vm3, %v442_v9 }
 0x1d9   :  { %v619_v10 = vpop.f32.mrb[14].mxu0 }
 0x1da   :  { %v643_v11 = vpop.f32.mrb[14].mxu1  ;;  %477 = vst.msk [vmem:[%s879_s3 + $0x78] sm:$0xff] %vm461_vm3, %v619_v10  ;;  %v372_v12 = vpop.f32.mrb[15].mxu0 }
 0x1db   :  { %493 = vst.msk [vmem:[%s879_s3 + $0xf8] sm:$0xff] %vm461_vm3, %v643_v11  ;;  %v452_v13 = vpop.f32.mrb[15].mxu1  ;;  %476 = vst.msk [vmem:[%s879_s3 + $0x70] sm:$0xff] %vm461_vm3, %v372_v12 }
 0x1dc   :  { %492 = vst.msk [vmem:[%s879_s3 + $0xf0] sm:$0xff] %vm461_vm3, %v452_v13 }

</bundles_post_ra>
